<compile_context>
chip_gen: v5e
topology: v5e:2x2
jax: 0.10.0
libtpu: 0.0.40
codegen_flags: <defaults>
</compile_context>

<pallas_src>
import functools

import numpy as np
import jax
import jax.numpy as jnp
from jax import lax
from jax.experimental import pallas as pl
from jax.experimental.pallas import tpu as pltpu


def matlab_style_gauss2d(shape=(3, 3), sigma=0.5):
    """Same as MATLAB fspecial('gaussian', shape, sigma); matches the PyTorch module."""
    m, n = [(ss - 1.0) / 2.0 for ss in shape]
    y, x = np.ogrid[-m:m + 1, -n:n + 1]
    h = np.exp(-(x * x + y * y) / (2.0 * sigma * sigma))
    h[h < np.finfo(h.dtype).eps * h.max()] = 0
    sumh = h.sum()
    if sumh != 0:
        h /= sumh
    return h


def make_gaussian_weight(kernel_size=3, sigma=0.5, n_channels=3):
    """Deterministic buffer init: shape (C, 1, K, K) float32, like the module's __init__."""
    kernel = matlab_style_gauss2d(shape=(kernel_size, kernel_size), sigma=sigma)
    w = np.stack([kernel[None, :, :] for _ in range(n_channels)])  # (C, 1, K, K)
    return jnp.asarray(w, dtype=jnp.float32)


def _try_separate(kernel_2d, tol=1e-7):
    """Factor a KxK kernel as outer(col, row) if it is numerically rank-1, else None."""
    k = np.asarray(kernel_2d, dtype=np.float64)
    u, s, vt = np.linalg.svd(k)
    if s[0] == 0.0:
        return np.zeros(k.shape[0]), np.zeros(k.shape[1])
    if k.shape[0] > 1 and s[1] > tol * s[0]:
        return None
    col = u[:, 0] * np.sqrt(s[0])
    row = vt[0, :] * np.sqrt(s[0])
    if col[np.argmax(np.abs(col))] < 0:  # fix sign so Gaussian taps are positive
        col, row = -col, -row
    return col, row


def _shift_edge_clamp(x, offset, axis):
    """y[..., i, ...] = x[..., clamp(i + offset, 0, n-1), ...] along `axis`.

    Circular roll (XLU slot) + one VPU select pinning the wrapped entries to the
    replicated edge value. No padded scratch, no misaligned window slices.
    """
    if offset == 0:
        return x
    n = x.shape[axis]
    rolled = pltpu.roll(x, shift=(-offset) % n, axis=axis)
    idx = lax.broadcasted_iota(jnp.int32, x.shape, axis)
    if offset > 0:
        edge = lax.slice_in_dim(x, n - 1, n, axis=axis)   # last row/col
        mask = idx >= (n - offset)
    else:
        edge = lax.slice_in_dim(x, 0, 1, axis=axis)        # first row/col
        mask = idx < (-offset)
    return jnp.where(mask, jnp.broadcast_to(edge, x.shape), rolled)


def _blur_kernel(x_ref, o_ref, *, C, H, W, K, same, sep_taps, full_taps):
    # x_ref: (1, C, H, W) input slab for one batch element (input dtype)
    # o_ref: (1, C, Ho, Wo) blurred output slab (same dtype as input)
    p = (K - 1) // 2
    Ho, Wo = (H, W) if same else (H - K + 1, W - K + 1)

    for c in range(C):  # C is small & static -> fully unrolled
        x = x_ref[0, c, :, :].astype(jnp.float32)  # in-VMEM cast (free under mem bound)

        if sep_taps is not None:
            col_taps, row_taps = sep_taps[c]
            # --- horizontal pass (K taps along the lane axis) ---
            h = None
            for kw in range(K):
                t = float(row_taps[kw])
                if t == 0.0:
                    continue
                win = _shift_edge_clamp(x, kw - p, axis=1) if same else x[:, kw:kw + Wo]
                term = win * t
                h = term if h is None else h + term
            if h is None:
                h = jnp.zeros((H, Wo), jnp.float32)
            # --- vertical pass (K taps along the sublane axis) ---
            acc = None
            for kh in range(K):
                t = float(col_taps[kh])
                if t == 0.0:
                    continue
                win = _shift_edge_clamp(h, kh - p, axis=0) if same else h[kh:kh + Ho, :]
                term = win * t
                acc = term if acc is None else acc + term
        else:
            # Generic 2D fallback (non-separable weight).
            if same:
                xs = {}
                for kw in range(K):
                    if any(full_taps[c][kh][kw] != 0.0 for kh in range(K)):
                        xs[kw] = _shift_edge_clamp(x, kw - p, axis=1)
                acc = None
                for kh in range(K):
                    row_comb = None
                    for kw in range(K):
                        t = float(full_taps[c][kh][kw])
                        if t == 0.0:
                            continue
                        term = xs[kw] * t
                        row_comb = term if row_comb is None else row_comb + term
                    if row_comb is None:
                        continue
                    term = _shift_edge_clamp(row_comb, kh - p, axis=0)
                    acc = term if acc is None else acc + term
            else:
                acc = None
                for kh in range(K):
                    for kw in range(K):
                        t = float(full_taps[c][kh][kw])
                        if t == 0.0:
                            continue
                        term = x[kh:kh + Ho, kw:kw + Wo] * t
                        acc = term if acc is None else acc + term

        if acc is None:
            acc = jnp.zeros((Ho, Wo), jnp.float32)
        o_ref[0, c, :, :] = acc.astype(o_ref.dtype)


def gaussian_blur(x, weight, *, kernel_size, same=True):
    """x: (B, C, H, W); weight: (C, 1, K, K) fixed Gaussian buffer.
    Output dtype == input dtype (f32 accumulation internally).
    Returns (B, C, H, W) if same=True, else the 'valid' output (B, C, H-K+1, W-K+1)."""
    B, C, H, W = x.shape
    K = int(kernel_size)
    p = (K - 1) // 2
    if same:
        # ReplicationPad2d((K-1)//2) only preserves shape for odd K (same as PyTorch).
        assert K % 2 == 1, "same=True requires an odd kernel_size"
        Ho, Wo = H, W
    else:
        Ho, Wo = H - K + 1, W - K + 1

    # Non-trainable buffer -> bake taps as compile-time immediates (no weight DMA).
    w_np = np.asarray(weight, dtype=np.float64).reshape(C, K, K)
    sep = []
    separable = True
    for c in range(C):
        f = _try_separate(w_np[c])
        if f is None:
            separable = False
            break
        col, row = f
        sep.append((tuple(float(v) for v in col), tuple(float(v) for v in row)))
    sep_taps = tuple(sep) if separable else None
    full_taps = tuple(tuple(tuple(float(v) for v in r) for r in ch) for ch in w_np)

    out_dtype = x.dtype

    kernel = functools.partial(
        _blur_kernel, C=C, H=H, W=W, K=K, same=same,
        sep_taps=sep_taps, full_taps=full_taps)

    # VMEM budget from the actual per-step footprint:
    # double-buffered in + out blocks plus f32 value-chain headroom.
    in_bytes = C * H * W * jnp.dtype(x.dtype).itemsize
    out_bytes = C * Ho * Wo * jnp.dtype(out_dtype).itemsize
    budget = 2 * (in_bytes + out_bytes) + 8 * C * H * W * 4
    vmem_limit = int(min(max(budget, 32 * 1024 * 1024), 64 * 1024 * 1024))

    return pl.pallas_call(
        kernel,
        out_shape=jax.ShapeDtypeStruct((B, C, Ho, Wo), out_dtype),
        grid_spec=pltpu.PrefetchScalarGridSpec(
            num_scalar_prefetch=0,
            grid=(B,),
            in_specs=[
                # one full (C, H, W) slab (all channels of one batch element) per step
                pl.BlockSpec((1, C, H, W), lambda b: (b, 0, 0, 0)),
            ],
            out_specs=pl.BlockSpec((1, C, Ho, Wo), lambda b: (b, 0, 0, 0)),
        ),
        compiler_params=pltpu.CompilerParams(
            dimension_semantics=("parallel",),
            vmem_limit_bytes=vmem_limit,
        ),
    )(x)


def random_gaussian_blur(x, weight, *, prob_blur, kernel_size, same=True, u=None):
    """RandomGaussianBlur.forward: host-side Bernoulli draw (np.random.rand() in the
    PyTorch module), then either the Pallas Gaussian blur or identity. Both branches
    return x's dtype."""
    if u is None:
        u = np.random.rand()
    if u < prob_blur:
        return gaussian_blur(x, weight, kernel_size=kernel_size, same=same)
    return x


if __name__ == "__main__":
    kernel_size = 3
    sigma = 0.5
    n_channels = 4

    key = jax.random.PRNGKey(0)
    x = jax.random.normal(key, (2, n_channels, 16, 16), dtype=jnp.float32)
    weight = make_gaussian_weight(kernel_size, sigma, n_channels)  # (C, 1, K, K)

    # Blur path (prob_blur=1.0 -> deterministic).
    y = random_gaussian_blur(x, weight, prob_blur=1.0, kernel_size=kernel_size)
    y = jax.block_until_ready(y)
    assert y.shape == x.shape and y.dtype == x.dtype

    # Reference: XLA replication pad + grouped (depthwise) conv. Pad only for the
    # reference check; the Pallas path never materializes a padded array.
    pad = (kernel_size - 1) // 2
    xp = jnp.pad(x, ((0, 0), (0, 0), (pad, pad), (pad, pad)), mode="edge")
    ref = jax.lax.conv_general_dilated(
        xp, weight,
        window_strides=(1, 1),
        padding="VALID",
        dimension_numbers=("NCHW", "OIHW", "NCHW"),
        feature_group_count=n_channels,
    )
    np.testing.assert_allclose(np.asarray(y), np.asarray(ref), rtol=1e-5, atol=1e-5)

    # Identity path of RandomGaussianBlur (prob_blur beaten) returns x unchanged.
    y_id = random_gaussian_blur(x, weight, prob_blur=0.0, kernel_size=kernel_size)
    np.testing.assert_allclose(np.asarray(y_id), np.asarray(x))
    assert y_id.dtype == x.dtype

    # bf16 I/O variant (v6e/v7x win): bf16 in -> f32 compute -> bf16 out.
    y_bf = random_gaussian_blur(x.astype(jnp.bfloat16), weight,
                                prob_blur=1.0, kernel_size=kernel_size)
    y_bf = jax.block_until_ready(y_bf)
    assert y_bf.dtype == jnp.bfloat16 and y_bf.shape == x.shape
    np.testing.assert_allclose(np.asarray(y_bf.astype(jnp.float32)), np.asarray(ref),
                               rtol=5e-2, atol=5e-2)

    print("KERNEL_OK")
</pallas_src>

<mosaic_0001>
module attributes {stable_mosaic.version = 11 : i64} {
  func.func @_blur_kernel(%arg0: i32, %arg1: memref<1x4x16x16xf32, #tpu.memory_space<vmem>>, %arg2: memref<1x4x16x16xf32, #tpu.memory_space<vmem>>) attributes {dimension_semantics = [#tpu.dimension_semantics<parallel>], iteration_bounds = array<i64: 2>, scalar_prefetch = 0 : i64, scratch_operands = 0 : i64, tpu.core_type = #tpu.core_type<tc>, window_params = [{transform_indices = @transform_0, window_bounds = array<i64: 1, 4, 16, 16>}, {transform_indices = @transform_1, window_bounds = array<i64: 1, 4, 16, 16>}]} {
    %c0 = arith.constant 0 : index
    %c0_0 = arith.constant 0 : index
    %c0_1 = arith.constant 0 : index
    %c0_2 = arith.constant 0 : index
    %0 = vector.load %arg1[%c0, %c0_0, %c0_1, %c0_2] : memref<1x4x16x16xf32, #tpu.memory_space<vmem>>, vector<1x1x16x16xf32>
    %1 = vector.shape_cast %0 : vector<1x1x16x16xf32> to vector<16x16xf32>
    %c1_i32 = arith.constant 1 : i32
    %2 = tpu.dynamic_rotate %1 by %c1_i32 dim 1 : vector<16x16xf32>, i32 -> vector<16x16xf32>
    %3 = tpu.iota {dimensions = array<i32: 1>} : vector<16x16xi32>
    %4 = vector.extract_strided_slice %1 {offsets = [0, 0], sizes = [16, 1], strides = [1, 1]} : vector<16x16xf32> to vector<16x1xf32>
    %c1_i32_3 = arith.constant 1 : i32
    %5 = vector.broadcast %c1_i32_3 : i32 to vector<16x16xi32>
    %6 = arith.cmpi slt, %3, %5 : vector<16x16xi32>
    %7 = vector.shape_cast %4 : vector<16x1xf32> to vector<16x1xf32>
    %8 = vector.broadcast %7 : vector<16x1xf32> to vector<16x16xf32>
    %9 = arith.select %6, %8, %2 : vector<16x16xi1>, vector<16x16xf32>
    %cst = arith.constant 0.106506981 : f32
    %10 = vector.broadcast %cst : f32 to vector<16x16xf32>
    %11 = arith.mulf %9, %10 : vector<16x16xf32>
    %cst_4 = arith.constant 0.786986052 : f32
    %12 = vector.broadcast %cst_4 : f32 to vector<16x16xf32>
    %13 = arith.mulf %1, %12 : vector<16x16xf32>
    %14 = arith.addf %11, %13 : vector<16x16xf32>
    %c15_i32 = arith.constant 15 : i32
    %15 = tpu.dynamic_rotate %1 by %c15_i32 dim 1 : vector<16x16xf32>, i32 -> vector<16x16xf32>
    %16 = tpu.iota {dimensions = array<i32: 1>} : vector<16x16xi32>
    %17 = vector.extract_strided_slice %1 {offsets = [0, 15], sizes = [16, 1], strides = [1, 1]} : vector<16x16xf32> to vector<16x1xf32>
    %c15_i32_5 = arith.constant 15 : i32
    %18 = vector.broadcast %c15_i32_5 : i32 to vector<16x16xi32>
    %19 = arith.cmpi sge, %16, %18 : vector<16x16xi32>
    %20 = vector.shape_cast %17 : vector<16x1xf32> to vector<16x1xf32>
    %21 = vector.broadcast %20 : vector<16x1xf32> to vector<16x16xf32>
    %22 = arith.select %19, %21, %15 : vector<16x16xi1>, vector<16x16xf32>
    %cst_6 = arith.constant 0.106506981 : f32
    %23 = vector.broadcast %cst_6 : f32 to vector<16x16xf32>
    %24 = arith.mulf %22, %23 : vector<16x16xf32>
    %25 = arith.addf %14, %24 : vector<16x16xf32>
    %c1_i32_7 = arith.constant 1 : i32
    %26 = tpu.dynamic_rotate %25 by %c1_i32_7 dim 0 : vector<16x16xf32>, i32 -> vector<16x16xf32>
    %27 = tpu.iota {dimensions = array<i32: 0>} : vector<16x16xi32>
    %28 = vector.extract_strided_slice %25 {offsets = [0, 0], sizes = [1, 16], strides = [1, 1]} : vector<16x16xf32> to vector<1x16xf32>
    %c1_i32_8 = arith.constant 1 : i32
    %29 = vector.broadcast %c1_i32_8 : i32 to vector<16x16xi32>
    %30 = arith.cmpi slt, %27, %29 : vector<16x16xi32>
    %31 = vector.shape_cast %28 : vector<1x16xf32> to vector<1x16xf32>
    %32 = vector.broadcast %31 : vector<1x16xf32> to vector<16x16xf32>
    %33 = arith.select %30, %32, %26 : vector<16x16xi1>, vector<16x16xf32>
    %cst_9 = arith.constant 0.106506981 : f32
    %34 = vector.broadcast %cst_9 : f32 to vector<16x16xf32>
    %35 = arith.mulf %33, %34 : vector<16x16xf32>
    %cst_10 = arith.constant 0.786986052 : f32
    %36 = vector.broadcast %cst_10 : f32 to vector<16x16xf32>
    %37 = arith.mulf %25, %36 : vector<16x16xf32>
    %38 = arith.addf %35, %37 : vector<16x16xf32>
    %c15_i32_11 = arith.constant 15 : i32
    %39 = tpu.dynamic_rotate %25 by %c15_i32_11 dim 0 : vector<16x16xf32>, i32 -> vector<16x16xf32>
    %40 = tpu.iota {dimensions = array<i32: 0>} : vector<16x16xi32>
    %41 = vector.extract_strided_slice %25 {offsets = [15, 0], sizes = [1, 16], strides = [1, 1]} : vector<16x16xf32> to vector<1x16xf32>
    %c15_i32_12 = arith.constant 15 : i32
    %42 = vector.broadcast %c15_i32_12 : i32 to vector<16x16xi32>
    %43 = arith.cmpi sge, %40, %42 : vector<16x16xi32>
    %44 = vector.shape_cast %41 : vector<1x16xf32> to vector<1x16xf32>
    %45 = vector.broadcast %44 : vector<1x16xf32> to vector<16x16xf32>
    %46 = arith.select %43, %45, %39 : vector<16x16xi1>, vector<16x16xf32>
    %cst_13 = arith.constant 0.106506981 : f32
    %47 = vector.broadcast %cst_13 : f32 to vector<16x16xf32>
    %48 = arith.mulf %46, %47 : vector<16x16xf32>
    %49 = arith.addf %38, %48 : vector<16x16xf32>
    %c0_14 = arith.constant 0 : index
    %c0_15 = arith.constant 0 : index
    %c0_16 = arith.constant 0 : index
    %c0_17 = arith.constant 0 : index
    %50 = vector.load %arg2[%c0_14, %c0_15, %c0_16, %c0_17] : memref<1x4x16x16xf32, #tpu.memory_space<vmem>>, vector<1x1x16x16xf32>
    %51 = vector.shape_cast %50 : vector<1x1x16x16xf32> to vector<16x16xf32>
    %52 = vector.shape_cast %49 : vector<16x16xf32> to vector<1x1x16x16xf32>
    tpu.vector_store %arg2[%c0_14, %c0_15, %c0_16, %c0_17], %52 {strides = array<i32>} : memref<1x4x16x16xf32, #tpu.memory_space<vmem>>, vector<1x1x16x16xf32>,
    %c0_18 = arith.constant 0 : index
    %c1 = arith.constant 1 : index
    %c0_19 = arith.constant 0 : index
    %c0_20 = arith.constant 0 : index
    %53 = vector.load %arg1[%c0_18, %c1, %c0_19, %c0_20] : memref<1x4x16x16xf32, #tpu.memory_space<vmem>>, vector<1x1x16x16xf32>
    %54 = vector.shape_cast %53 : vector<1x1x16x16xf32> to vector<16x16xf32>
    %c1_i32_21 = arith.constant 1 : i32
    %55 = tpu.dynamic_rotate %54 by %c1_i32_21 dim 1 : vector<16x16xf32>, i32 -> vector<16x16xf32>
    %56 = tpu.iota {dimensions = array<i32: 1>} : vector<16x16xi32>
    %57 = vector.extract_strided_slice %54 {offsets = [0, 0], sizes = [16, 1], strides = [1, 1]} : vector<16x16xf32> to vector<16x1xf32>
    %c1_i32_22 = arith.constant 1 : i32
    %58 = vector.broadcast %c1_i32_22 : i32 to vector<16x16xi32>
    %59 = arith.cmpi slt, %56, %58 : vector<16x16xi32>
    %60 = vector.shape_cast %57 : vector<16x1xf32> to vector<16x1xf32>
    %61 = vector.broadcast %60 : vector<16x1xf32> to vector<16x16xf32>
    %62 = arith.select %59, %61, %55 : vector<16x16xi1>, vector<16x16xf32>
    %cst_23 = arith.constant 0.106506981 : f32
    %63 = vector.broadcast %cst_23 : f32 to vector<16x16xf32>
    %64 = arith.mulf %62, %63 : vector<16x16xf32>
    %cst_24 = arith.constant 0.786986052 : f32
    %65 = vector.broadcast %cst_24 : f32 to vector<16x16xf32>
    %66 = arith.mulf %54, %65 : vector<16x16xf32>
    %67 = arith.addf %64, %66 : vector<16x16xf32>
    %c15_i32_25 = arith.constant 15 : i32
    %68 = tpu.dynamic_rotate %54 by %c15_i32_25 dim 1 : vector<16x16xf32>, i32 -> vector<16x16xf32>
    %69 = tpu.iota {dimensions = array<i32: 1>} : vector<16x16xi32>
    %70 = vector.extract_strided_slice %54 {offsets = [0, 15], sizes = [16, 1], strides = [1, 1]} : vector<16x16xf32> to vector<16x1xf32>
    %c15_i32_26 = arith.constant 15 : i32
    %71 = vector.broadcast %c15_i32_26 : i32 to vector<16x16xi32>
    %72 = arith.cmpi sge, %69, %71 : vector<16x16xi32>
    %73 = vector.shape_cast %70 : vector<16x1xf32> to vector<16x1xf32>
    %74 = vector.broadcast %73 : vector<16x1xf32> to vector<16x16xf32>
    %75 = arith.select %72, %74, %68 : vector<16x16xi1>, vector<16x16xf32>
    %cst_27 = arith.constant 0.106506981 : f32
    %76 = vector.broadcast %cst_27 : f32 to vector<16x16xf32>
    %77 = arith.mulf %75, %76 : vector<16x16xf32>
    %78 = arith.addf %67, %77 : vector<16x16xf32>
    %c1_i32_28 = arith.constant 1 : i32
    %79 = tpu.dynamic_rotate %78 by %c1_i32_28 dim 0 : vector<16x16xf32>, i32 -> vector<16x16xf32>
    %80 = tpu.iota {dimensions = array<i32: 0>} : vector<16x16xi32>
    %81 = vector.extract_strided_slice %78 {offsets = [0, 0], sizes = [1, 16], strides = [1, 1]} : vector<16x16xf32> to vector<1x16xf32>
    %c1_i32_29 = arith.constant 1 : i32
    %82 = vector.broadcast %c1_i32_29 : i32 to vector<16x16xi32>
    %83 = arith.cmpi slt, %80, %82 : vector<16x16xi32>
    %84 = vector.shape_cast %81 : vector<1x16xf32> to vector<1x16xf32>
    %85 = vector.broadcast %84 : vector<1x16xf32> to vector<16x16xf32>
    %86 = arith.select %83, %85, %79 : vector<16x16xi1>, vector<16x16xf32>
    %cst_30 = arith.constant 0.106506981 : f32
    %87 = vector.broadcast %cst_30 : f32 to vector<16x16xf32>
    %88 = arith.mulf %86, %87 : vector<16x16xf32>
    %cst_31 = arith.constant 0.786986052 : f32
    %89 = vector.broadcast %cst_31 : f32 to vector<16x16xf32>
    %90 = arith.mulf %78, %89 : vector<16x16xf32>
    %91 = arith.addf %88, %90 : vector<16x16xf32>
    %c15_i32_32 = arith.constant 15 : i32
    %92 = tpu.dynamic_rotate %78 by %c15_i32_32 dim 0 : vector<16x16xf32>, i32 -> vector<16x16xf32>
    %93 = tpu.iota {dimensions = array<i32: 0>} : vector<16x16xi32>
    %94 = vector.extract_strided_slice %78 {offsets = [15, 0], sizes = [1, 16], strides = [1, 1]} : vector<16x16xf32> to vector<1x16xf32>
    %c15_i32_33 = arith.constant 15 : i32
    %95 = vector.broadcast %c15_i32_33 : i32 to vector<16x16xi32>
    %96 = arith.cmpi sge, %93, %95 : vector<16x16xi32>
    %97 = vector.shape_cast %94 : vector<1x16xf32> to vector<1x16xf32>
    %98 = vector.broadcast %97 : vector<1x16xf32> to vector<16x16xf32>
    %99 = arith.select %96, %98, %92 : vector<16x16xi1>, vector<16x16xf32>
    %cst_34 = arith.constant 0.106506981 : f32
    %100 = vector.broadcast %cst_34 : f32 to vector<16x16xf32>
    %101 = arith.mulf %99, %100 : vector<16x16xf32>
    %102 = arith.addf %91, %101 : vector<16x16xf32>
    %c0_35 = arith.constant 0 : index
    %c1_36 = arith.constant 1 : index
    %c0_37 = arith.constant 0 : index
    %c0_38 = arith.constant 0 : index
    %103 = vector.load %arg2[%c0_35, %c1_36, %c0_37, %c0_38] : memref<1x4x16x16xf32, #tpu.memory_space<vmem>>, vector<1x1x16x16xf32>
    %104 = vector.shape_cast %103 : vector<1x1x16x16xf32> to vector<16x16xf32>
    %105 = vector.shape_cast %102 : vector<16x16xf32> to vector<1x1x16x16xf32>
    tpu.vector_store %arg2[%c0_35, %c1_36, %c0_37, %c0_38], %105 {strides = array<i32>} : memref<1x4x16x16xf32, #tpu.memory_space<vmem>>, vector<1x1x16x16xf32>,
    %c0_39 = arith.constant 0 : index
    %c2 = arith.constant 2 : index
    %c0_40 = arith.constant 0 : index
    %c0_41 = arith.constant 0 : index
    %106 = vector.load %arg1[%c0_39, %c2, %c0_40, %c0_41] : memref<1x4x16x16xf32, #tpu.memory_space<vmem>>, vector<1x1x16x16xf32>
    %107 = vector.shape_cast %106 : vector<1x1x16x16xf32> to vector<16x16xf32>
    %c1_i32_42 = arith.constant 1 : i32
    %108 = tpu.dynamic_rotate %107 by %c1_i32_42 dim 1 : vector<16x16xf32>, i32 -> vector<16x16xf32>
    %109 = tpu.iota {dimensions = array<i32: 1>} : vector<16x16xi32>
    %110 = vector.extract_strided_slice %107 {offsets = [0, 0], sizes = [16, 1], strides = [1, 1]} : vector<16x16xf32> to vector<16x1xf32>
    %c1_i32_43 = arith.constant 1 : i32
    %111 = vector.broadcast %c1_i32_43 : i32 to vector<16x16xi32>
    %112 = arith.cmpi slt, %109, %111 : vector<16x16xi32>
    %113 = vector.shape_cast %110 : vector<16x1xf32> to vector<16x1xf32>
    %114 = vector.broadcast %113 : vector<16x1xf32> to vector<16x16xf32>
    %115 = arith.select %112, %114, %108 : vector<16x16xi1>, vector<16x16xf32>
    %cst_44 = arith.constant 0.106506981 : f32
    %116 = vector.broadcast %cst_44 : f32 to vector<16x16xf32>
    %117 = arith.mulf %115, %116 : vector<16x16xf32>
    %cst_45 = arith.constant 0.786986052 : f32
    %118 = vector.broadcast %cst_45 : f32 to vector<16x16xf32>
    %119 = arith.mulf %107, %118 : vector<16x16xf32>
    %120 = arith.addf %117, %119 : vector<16x16xf32>
    %c15_i32_46 = arith.constant 15 : i32
    %121 = tpu.dynamic_rotate %107 by %c15_i32_46 dim 1 : vector<16x16xf32>, i32 -> vector<16x16xf32>
    %122 = tpu.iota {dimensions = array<i32: 1>} : vector<16x16xi32>
    %123 = vector.extract_strided_slice %107 {offsets = [0, 15], sizes = [16, 1], strides = [1, 1]} : vector<16x16xf32> to vector<16x1xf32>
    %c15_i32_47 = arith.constant 15 : i32
    %124 = vector.broadcast %c15_i32_47 : i32 to vector<16x16xi32>
    %125 = arith.cmpi sge, %122, %124 : vector<16x16xi32>
    %126 = vector.shape_cast %123 : vector<16x1xf32> to vector<16x1xf32>
    %127 = vector.broadcast %126 : vector<16x1xf32> to vector<16x16xf32>
    %128 = arith.select %125, %127, %121 : vector<16x16xi1>, vector<16x16xf32>
    %cst_48 = arith.constant 0.106506981 : f32
    %129 = vector.broadcast %cst_48 : f32 to vector<16x16xf32>
    %130 = arith.mulf %128, %129 : vector<16x16xf32>
    %131 = arith.addf %120, %130 : vector<16x16xf32>
    %c1_i32_49 = arith.constant 1 : i32
    %132 = tpu.dynamic_rotate %131 by %c1_i32_49 dim 0 : vector<16x16xf32>, i32 -> vector<16x16xf32>
    %133 = tpu.iota {dimensions = array<i32: 0>} : vector<16x16xi32>
    %134 = vector.extract_strided_slice %131 {offsets = [0, 0], sizes = [1, 16], strides = [1, 1]} : vector<16x16xf32> to vector<1x16xf32>
    %c1_i32_50 = arith.constant 1 : i32
    %135 = vector.broadcast %c1_i32_50 : i32 to vector<16x16xi32>
    %136 = arith.cmpi slt, %133, %135 : vector<16x16xi32>
    %137 = vector.shape_cast %134 : vector<1x16xf32> to vector<1x16xf32>
    %138 = vector.broadcast %137 : vector<1x16xf32> to vector<16x16xf32>
    %139 = arith.select %136, %138, %132 : vector<16x16xi1>, vector<16x16xf32>
    %cst_51 = arith.constant 0.106506981 : f32
    %140 = vector.broadcast %cst_51 : f32 to vector<16x16xf32>
    %141 = arith.mulf %139, %140 : vector<16x16xf32>
    %cst_52 = arith.constant 0.786986052 : f32
    %142 = vector.broadcast %cst_52 : f32 to vector<16x16xf32>
    %143 = arith.mulf %131, %142 : vector<16x16xf32>
    %144 = arith.addf %141, %143 : vector<16x16xf32>
    %c15_i32_53 = arith.constant 15 : i32
    %145 = tpu.dynamic_rotate %131 by %c15_i32_53 dim 0 : vector<16x16xf32>, i32 -> vector<16x16xf32>
    %146 = tpu.iota {dimensions = array<i32: 0>} : vector<16x16xi32>
    %147 = vector.extract_strided_slice %131 {offsets = [15, 0], sizes = [1, 16], strides = [1, 1]} : vector<16x16xf32> to vector<1x16xf32>
    %c15_i32_54 = arith.constant 15 : i32
    %148 = vector.broadcast %c15_i32_54 : i32 to vector<16x16xi32>
    %149 = arith.cmpi sge, %146, %148 : vector<16x16xi32>
    %150 = vector.shape_cast %147 : vector<1x16xf32> to vector<1x16xf32>
    %151 = vector.broadcast %150 : vector<1x16xf32> to vector<16x16xf32>
    %152 = arith.select %149, %151, %145 : vector<16x16xi1>, vector<16x16xf32>
    %cst_55 = arith.constant 0.106506981 : f32
    %153 = vector.broadcast %cst_55 : f32 to vector<16x16xf32>
    %154 = arith.mulf %152, %153 : vector<16x16xf32>
    %155 = arith.addf %144, %154 : vector<16x16xf32>
    %c0_56 = arith.constant 0 : index
    %c2_57 = arith.constant 2 : index
    %c0_58 = arith.constant 0 : index
    %c0_59 = arith.constant 0 : index
    %156 = vector.load %arg2[%c0_56, %c2_57, %c0_58, %c0_59] : memref<1x4x16x16xf32, #tpu.memory_space<vmem>>, vector<1x1x16x16xf32>
    %157 = vector.shape_cast %156 : vector<1x1x16x16xf32> to vector<16x16xf32>
    %158 = vector.shape_cast %155 : vector<16x16xf32> to vector<1x1x16x16xf32>
    tpu.vector_store %arg2[%c0_56, %c2_57, %c0_58, %c0_59], %158 {strides = array<i32>} : memref<1x4x16x16xf32, #tpu.memory_space<vmem>>, vector<1x1x16x16xf32>,
    %c0_60 = arith.constant 0 : index
    %c3 = arith.constant 3 : index
    %c0_61 = arith.constant 0 : index
    %c0_62 = arith.constant 0 : index
    %159 = vector.load %arg1[%c0_60, %c3, %c0_61, %c0_62] : memref<1x4x16x16xf32, #tpu.memory_space<vmem>>, vector<1x1x16x16xf32>
    %160 = vector.shape_cast %159 : vector<1x1x16x16xf32> to vector<16x16xf32>
    %c1_i32_63 = arith.constant 1 : i32
    %161 = tpu.dynamic_rotate %160 by %c1_i32_63 dim 1 : vector<16x16xf32>, i32 -> vector<16x16xf32>
    %162 = tpu.iota {dimensions = array<i32: 1>} : vector<16x16xi32>
    %163 = vector.extract_strided_slice %160 {offsets = [0, 0], sizes = [16, 1], strides = [1, 1]} : vector<16x16xf32> to vector<16x1xf32>
    %c1_i32_64 = arith.constant 1 : i32
    %164 = vector.broadcast %c1_i32_64 : i32 to vector<16x16xi32>
    %165 = arith.cmpi slt, %162, %164 : vector<16x16xi32>
    %166 = vector.shape_cast %163 : vector<16x1xf32> to vector<16x1xf32>
    %167 = vector.broadcast %166 : vector<16x1xf32> to vector<16x16xf32>
    %168 = arith.select %165, %167, %161 : vector<16x16xi1>, vector<16x16xf32>
    %cst_65 = arith.constant 0.106506981 : f32
    %169 = vector.broadcast %cst_65 : f32 to vector<16x16xf32>
    %170 = arith.mulf %168, %169 : vector<16x16xf32>
    %cst_66 = arith.constant 0.786986052 : f32
    %171 = vector.broadcast %cst_66 : f32 to vector<16x16xf32>
    %172 = arith.mulf %160, %171 : vector<16x16xf32>
    %173 = arith.addf %170, %172 : vector<16x16xf32>
    %c15_i32_67 = arith.constant 15 : i32
    %174 = tpu.dynamic_rotate %160 by %c15_i32_67 dim 1 : vector<16x16xf32>, i32 -> vector<16x16xf32>
    %175 = tpu.iota {dimensions = array<i32: 1>} : vector<16x16xi32>
    %176 = vector.extract_strided_slice %160 {offsets = [0, 15], sizes = [16, 1], strides = [1, 1]} : vector<16x16xf32> to vector<16x1xf32>
    %c15_i32_68 = arith.constant 15 : i32
    %177 = vector.broadcast %c15_i32_68 : i32 to vector<16x16xi32>
    %178 = arith.cmpi sge, %175, %177 : vector<16x16xi32>
    %179 = vector.shape_cast %176 : vector<16x1xf32> to vector<16x1xf32>
    %180 = vector.broadcast %179 : vector<16x1xf32> to vector<16x16xf32>
    %181 = arith.select %178, %180, %174 : vector<16x16xi1>, vector<16x16xf32>
    %cst_69 = arith.constant 0.106506981 : f32
    %182 = vector.broadcast %cst_69 : f32 to vector<16x16xf32>
    %183 = arith.mulf %181, %182 : vector<16x16xf32>
    %184 = arith.addf %173, %183 : vector<16x16xf32>
    %c1_i32_70 = arith.constant 1 : i32
    %185 = tpu.dynamic_rotate %184 by %c1_i32_70 dim 0 : vector<16x16xf32>, i32 -> vector<16x16xf32>
    %186 = tpu.iota {dimensions = array<i32: 0>} : vector<16x16xi32>
    %187 = vector.extract_strided_slice %184 {offsets = [0, 0], sizes = [1, 16], strides = [1, 1]} : vector<16x16xf32> to vector<1x16xf32>
    %c1_i32_71 = arith.constant 1 : i32
    %188 = vector.broadcast %c1_i32_71 : i32 to vector<16x16xi32>
    %189 = arith.cmpi slt, %186, %188 : vector<16x16xi32>
    %190 = vector.shape_cast %187 : vector<1x16xf32> to vector<1x16xf32>
    %191 = vector.broadcast %190 : vector<1x16xf32> to vector<16x16xf32>
    %192 = arith.select %189, %191, %185 : vector<16x16xi1>, vector<16x16xf32>
    %cst_72 = arith.constant 0.106506981 : f32
    %193 = vector.broadcast %cst_72 : f32 to vector<16x16xf32>
    %194 = arith.mulf %192, %193 : vector<16x16xf32>
    %cst_73 = arith.constant 0.786986052 : f32
    %195 = vector.broadcast %cst_73 : f32 to vector<16x16xf32>
    %196 = arith.mulf %184, %195 : vector<16x16xf32>
    %197 = arith.addf %194, %196 : vector<16x16xf32>
    %c15_i32_74 = arith.constant 15 : i32
    %198 = tpu.dynamic_rotate %184 by %c15_i32_74 dim 0 : vector<16x16xf32>, i32 -> vector<16x16xf32>
    %199 = tpu.iota {dimensions = array<i32: 0>} : vector<16x16xi32>
    %200 = vector.extract_strided_slice %184 {offsets = [15, 0], sizes = [1, 16], strides = [1, 1]} : vector<16x16xf32> to vector<1x16xf32>
    %c15_i32_75 = arith.constant 15 : i32
    %201 = vector.broadcast %c15_i32_75 : i32 to vector<16x16xi32>
    %202 = arith.cmpi sge, %199, %201 : vector<16x16xi32>
    %203 = vector.shape_cast %200 : vector<1x16xf32> to vector<1x16xf32>
    %204 = vector.broadcast %203 : vector<1x16xf32> to vector<16x16xf32>
    %205 = arith.select %202, %204, %198 : vector<16x16xi1>, vector<16x16xf32>
    %cst_76 = arith.constant 0.106506981 : f32
    %206 = vector.broadcast %cst_76 : f32 to vector<16x16xf32>
    %207 = arith.mulf %205, %206 : vector<16x16xf32>
    %208 = arith.addf %197, %207 : vector<16x16xf32>
    %c0_77 = arith.constant 0 : index
    %c3_78 = arith.constant 3 : index
    %c0_79 = arith.constant 0 : index
    %c0_80 = arith.constant 0 : index
    %209 = vector.load %arg2[%c0_77, %c3_78, %c0_79, %c0_80] : memref<1x4x16x16xf32, #tpu.memory_space<vmem>>, vector<1x1x16x16xf32>
    %210 = vector.shape_cast %209 : vector<1x1x16x16xf32> to vector<16x16xf32>
    %211 = vector.shape_cast %208 : vector<16x16xf32> to vector<1x1x16x16xf32>
    tpu.vector_store %arg2[%c0_77, %c3_78, %c0_79, %c0_80], %211 {strides = array<i32>} : memref<1x4x16x16xf32, #tpu.memory_space<vmem>>, vector<1x1x16x16xf32>,
    return
  }
  func.func @transform_0(%arg0: i32) -> (i32, i32, i32, i32) {
    %c0_i32 = arith.constant 0 : i32
    %c0_i32_0 = arith.constant 0 : i32
    %c0_i32_1 = arith.constant 0 : i32
    %c0_i32_2 = arith.constant 0 : i32
    return %arg0, %c0_i32, %c0_i32_0, %c0_i32_1 : i32, i32, i32, i32
  }
  func.func @transform_1(%arg0: i32) -> (i32, i32, i32, i32) {
    %c0_i32 = arith.constant 0 : i32
    %c0_i32_0 = arith.constant 0 : i32
    %c0_i32_1 = arith.constant 0 : i32
    %c0_i32_2 = arith.constant 0 : i32
    return %arg0, %c0_i32, %c0_i32_0, %c0_i32_1 : i32, i32, i32, i32
  }
}

</mosaic_0001>

<bundles_post_ra>
// kernel: tpu_custom_call.1
= control target key start
LH: loop header
LB: loop body
LE: loop exit
PB: predicated region body
PF: predicated region fallthrough
CT: control target
= control target key end

     0   :  { %6 = vsyncpa [#allocation3], 0  ;;  %s1180_s0 = inlined_call_operand.hbm [shape: f32[2,4,16,16], index: 0, kind: input, shape index: {}]   ;;  %s1181_s1 = inlined_call_operand.hbm [shape: f32[2,4,16,16], index: 1, kind: output, shape index: {}]  }
   0x1   :  { %8 = vsyncpa [#allocation3 + $0x1], 0 }
   0x2   :  { %9 = vsyncpa [#allocation4], 0 }
   0x3   :  { %11 = vsyncpa [#allocation4 + $0x1], 0  ;;  %s800_s6 = smov 0   ;;  %s802_s7 = smov 0  }
   0x4   :  { %s804_s8 = smov 0   ;;  %s806_s9 = smov 0  }
   0x5 LB: > { %s821_s10 = sadd.s32 4294967295, %s779_s9   ;;  %s590_s11 = sadd.s32 4294967294, %s779_s9   ;;  %s779_s9 = sphi %s806_s9, %s1191_s9   ;;  %s775_s8 = sphi %s804_s8, %s1190_s8   ;;  %s771_s7 = sphi %s802_s7, %s1189_s7   ;;  %s767_s6 = sphi %s800_s6, %s1188_s6  }
   0x6   : > { %s825_s12 = sadd.s32 1, %s779_s9   ;;  %s24_s13 = sadd.s32 1, %s775_s8 }
   0x7   : > { %s21_s14 = ssub.s32 %s779_s9, %s825_s12  ;;  %p31_p0 = scmp.ne.s32.totalorder %s775_s8, %s771_s7 }
   0x8   : > { %p22_p1 = scmp.eq.s32.totalorder %s21_s14, 0  ;;  %p32_p2 = scmp.eq.s32.totalorder %s779_s9, 0 }
   0x9   : > { %p37_p3 = scmp.ne.s32.totalorder %s771_s7, %s767_s6  ;;  %p38_p4 = scmp.eq.s32.totalorder %s821_s10, 0 }
   0xa   : > { %s837_s15 = scalar_select %p22_p1, %s775_s8, %s24_s13  }
   0xb   : > { %p839_p5 = por %p32_p2, %p31_p0  ;;  %p843_p6 = por %p38_p4, %p37_p3 }
   0xc   : > { %p61_p7 = scmp.eq.s32.totalorder %s821_s10, 1  ;;  %p67_p8 = scmp.eq.s32.totalorder %s590_s11, 1 }
   0xd   : > { %p630_p10 = scmp.lt.s32.totalorder %s779_s9, 2  ;;  %s87_s20 = sand.u32 1, %s775_s8  }
   0xe   : > { %p850_p11 = por %p61_p7, %p31_p0  ;;  %p854_p12 = por %p67_p8, %p37_p3 }
   0xf   : > { %s616_s21 = sshll.u32 %s779_s9, 6  ;;  %s593_s22 = sshll.u32 %s87_s20, 6 }
  0x10   : > { %s96_s25 = scalar_lea.hbm %s1180_s0, %s616_s21  ;;  %s91_s27 = scalar_lea.vmem [#allocation2], %s593_s22 }
  0x11   : > { %s97_s26 = sshll.u32 %s96_s25, 4  ;;  %s99_s28 = sshll.u32 %s91_s27, 4  ;;  %s98_s26 = int_to_ptr.hbm [resolvable:$true] %s97_s26  ;;  %s100_s28 = int_to_ptr.vmem [resolvable:$true] %s99_s28 }
  0x12   : > { %p865_p13 = pnand %p630_p10, %p839_p5  ;;  %p596_p0 = scmp.ge.s32.totalorder %s779_s9, 1 }
  0x13   : > { %p107_p1 = scmp.lt.s32.totalorder %s779_s9, 3  ;;  %s88_s30 = scalar_lea.sflag [#allocation3], %s87_s20 }
  0x14   : > { %s683_s2 = sshra.s32 %s98_s26, 4  ;;  %p687_p3 = pneg %p865_p13  ;;  %s684_s2 = int_to_ptr.hbm [resolvable:$true] %s683_s2 }
  0x15   : > { %s685_s3 = scalar_lea.hbm %s684_s2, 64  ;;  %s690_s11 = scalar_lea.hbm %s1180_s0, 128 }
  0x16   : > { %p686_p2 = scmp.ne.s32.totalorder %s684_s2, %s685_s3  ;;  %p691_p5 = scmp.lt.s32.totalorder %s684_s2, %s1180_s0 }
  0x17   : > { %p692_p8 = scmp.lt.s32.totalorder %s690_s11, %s685_s3 }
  0x18   : > { %p688_p4 = pnand %p687_p3, %p686_p2 }
  0x19   : > { %p693_p10 = por %p692_p8, %p691_p5 }
  0x1a   : > { %p689_p7 = pneg %p688_p4 }
  0x1c   : > { %p694_p9 = pnand %p693_p10, %p689_p7 }
  0x1e   : > { %697 = shalt.err (!%p694_p9)
}
  0x1f   : > { %s781_s16 = smov 128   ;;  %s782_s20 = smov 8  }
  0x20   : > { %625 = dma.hbm_to_vmem [thread:$0]  (!%p865_p13), %s98_s26, 1024, %s100_s28, %s88_s30, %s781_s16, %s781_s16, %s782_s20  }
  0x21   : > { %p108_p2 = pnand %p596_p0, %p107_p1 }
  0x22   : > { %s886_s21 = sand.u32 (!%p108_p2), 1, %s771_s7  }
  0x23   : > { %111 = sbr.rel (%p108_p2) target bundleno = 466 (0x1d2), region = 24  ;;  %s597_s22 = sshll.u32 (!%p108_p2), %s886_s21, 6 }
  0x24   : > { %s114_s23 = scalar_lea.sflag (!%p108_p2), [#allocation3], %s886_s21  ;;  %s117_s24 = scalar_lea.vmem (!%p108_p2), [#allocation2], %s597_s22 }
  0x28   : > { %758 = dma.done.wait (%p843_p6), %s114_s23, 1024  }
  0x29   : > { %760 = vsyncadd (%p843_p6), %s114_s23, 4294966272  ;;  %v783_v0 = vmov 0   ;;  %v896_v1 = vld [vmem:[%s117_s24] sm:$0xff]  ;;  %v898_v2 = vld [vmem:[%s117_s24 + $0x10] sm:$0xff]  ;;  %s784_s25 = smov 16   ;;  %v785_v7 = vmov 15   ;;  %v152_v58 = vlaneseq }
  0x2a   : > { %673 = vset.pattern.permute.xlu2 %v783_v0  ;;  %676 = vset.pattern.permute.xlu1 %v783_v0  ;;  %v905_v3 = vld [vmem:[%s117_s24 + $0x8] sm:$0xff]  ;;  %v907_v4 = vld [vmem:[%s117_s24 + $0x20] sm:$0xff]  ;;  %v914_v5 = vld [vmem:[%s117_s24 + $0x30] sm:$0xff]  ;;  %vm139_vm0 = vcmask 1047680   ;;  %s786_s17 = smov 113   ;;  %s787_s26 = smov 127  }
  0x2b   : > { %675 = vset.pattern.permute.xlu0 %v783_v0  ;;  %157 = vperm.xlu2 %673, %v896_v1   ;;  %v916_v6 = vld [vmem:[%s117_s24 + $0x38] sm:$0xff]  ;;  %v929_v9 = vld [vmem:[%s117_s24 + $0x28] sm:$0xff]  ;;  %v1012_v59 = vand.u32 127, %v152_v58  ;;  %v178_v63 = vmul.f32 0.78698605, %v905_v3  ;;  %vm234_vm6 = vcmask 130048  }
  0x2c   : > { %140 = vrot.lane.b32.xlu0 %v896_v1, %s784_s25  ;;  %240 = vrot.lane.b32.xlu1 %v898_v2, %s784_s25  ;;  %v923_v8 = vld [vmem:[%s117_s24 + $0x18] sm:$0xff]  ;;  %s1065_s27 = scalar_lea.vmem [#allocation5], %s597_s22  ;;  %s617_s28 = sshll.u32 %s821_s10, 6 }
  0x2d   : > { %vm154_vm1 = vcmp.lt.s32.totalorder %v1012_v59, 1  ;;  %vm181_vm2 = vcmp.ge.s32.totalorder %v1012_v59, 15  ;;  %s513_s2 = scalar_lea.hbm %s1181_s1, %s617_s28  ;;  %s514_s10 = sshll.u32 %s1065_s27, 4  ;;  %s515_s10 = int_to_ptr.vmem [resolvable:$true] %s514_s10 }
  0x2e   : > { %s516_s3 = sshll.u32 %s513_s2, 4  ;;  %s502_s4 = scalar_lea.sflag [#allocation4], %s886_s21  ;;  %s517_s3 = int_to_ptr.hbm [resolvable:$true] %s516_s3 }
  0x2f   : > { %s727_s5 = sshra.s32 %s517_s3, 4  ;;  %s733_s16 = scalar_lea.hbm %s1181_s1, 128  ;;  %s728_s5 = int_to_ptr.hbm [resolvable:$true] %s727_s5 }
  0x30   : > { %s729_s11 = scalar_lea.hbm %s728_s5, 64  ;;  %p734_p0 = scmp.lt.s32.totalorder %s728_s5, %s1181_s1 }
  0x31   : > { %p730_p6 = scmp.ne.s32.totalorder %s728_s5, %s729_s11  ;;  %p735_p1 = scmp.lt.s32.totalorder %s733_s16, %s729_s11 }
  0x33   : > { %162 = vperm.xlu2 %673, %v905_v3   ;;  %p731_p9 = pnand %p730_p6, %p850_p11  ;;  %p736_p3 = por %p735_p1, %p734_p0 }
  0x34   : > { %143 = vrot.lane.b32.xlu0 %v905_v3, %s784_s25  ;;  %328 = vrot.lane.b32.xlu1 %v907_v4, %s784_s25 }
  0x35   : > { %p732_p13 = pneg %p731_p9 }
  0x37   : > { %p737_p4 = pnand %p736_p3, %p732_p13 }
  0x3b   : > { %674 = vset.pattern.permute.xlu2 %v785_v7 }
  0x3c   : > { %416 = vrot.lane.b32.xlu0 %v914_v5, %s784_s25  ;;  %183 = vperm.xlu2 %674, %v896_v1  }
  0x3d   : > { %419 = vrot.lane.b32.xlu1 %v916_v6, %s784_s25 }
  0x44   : > { %254 = vperm.xlu0 %675, %v898_v2   ;;  %243 = vrot.lane.b32.xlu2 %v923_v8, %s784_s25 }
  0x45   : > { %259 = vperm.xlu1 %676, %v923_v8  }
  0x4c   : > { %435 = vperm.xlu0 %675, %v916_v6   ;;  %331 = vrot.lane.b32.xlu2 %v929_v9, %s784_s25 }
  0x4d   : > { %677 = vset.pattern.permute.xlu1 %v785_v7 }
  0x4e   : > { %283 = vperm.xlu1 %677, %v923_v8  }
  0x54   : > { %680 = vset.pattern.permute.xlu0 %v785_v7  ;;  %279 = vperm.xlu2 %674, %v898_v2  }
  0x56   : > { %678 = vset.pattern.permute.xlu1 %v783_v0 }
  0x57   : > { %342 = vperm.xlu1 %678, %v907_v4  }
  0x5c   : > { %679 = vset.pattern.permute.xlu2 %v783_v0 }
  0x5d   : > { %347 = vperm.xlu2 %679, %v929_v9  }
  0x5f   : > { %681 = vset.pattern.permute.xlu1 %v785_v7 }
  0x65   : > { %430 = vperm.xlu2 %679, %v914_v5  }
  0x6d   : > { %682 = vset.pattern.permute.xlu2 %v785_v7 }
  0x85   : > { %v939_v10 = vpop.permute.xlu2 %157 }
  0x8d   : > { %v941_v11 = vpop.permute.xlu2 %162 }
  0x96   : > { %v943_v12 = vpop.permute.xlu2 %183 }
  0x9e   : > { %v141_v13 = vpop.permute.xlu0 %140  ;;  %v244_v14 = vpop.permute.xlu2 %243 }
  0x9f   : > { %v142_v15 = vsel %vm139_vm0, %v141_v13, %v896_v1  ;;  %v241_v16 = vpop.permute.xlu1 %240  ;;  %v245_v18 = vsel %vm139_vm0, %v244_v14, %v923_v8 }
  0xa0   : > { %146 = vrot.lane.b32.xlu1 %v142_v15, %s784_s25  ;;  %v242_v17 = vsel %vm139_vm0, %v241_v16, %v898_v2  ;;  %248 = vrot.lane.b32.xlu2 %v245_v18, %s784_s25  ;;  %v1025_v15 = vshrl.u32 %v152_v58, 7  ;;  %v177_v18 = vmul.f32 0.78698605, %v896_v1 }
  0xa1   : > { %246 = vrot.lane.b32.xlu0 %v242_v17, %s784_s25 }
  0xa2   : > { %vm206_vm3 = vcmp.lt.s32.totalorder %v1025_v15, 1  ;;  %vm222_vm4 = vcmp.lt.s32.totalorder %v1025_v15, 7 }
  0xa6   : > { %v144_v19 = vpop.permute.xlu0 %143  ;;  %v332_v23 = vpop.permute.xlu2 %331 }
  0xa7   : > { %v145_v20 = vsel %vm139_vm0, %v144_v19, %v905_v3  ;;  %v329_v21 = vpop.permute.xlu1 %328  ;;  %v333_v24 = vsel %vm139_vm0, %v332_v23, %v929_v9 }
  0xa8   : > { %148 = vrot.lane.b32.xlu1 %v145_v20, %s784_s25  ;;  %v330_v22 = vsel %vm139_vm0, %v329_v21, %v907_v4 }
  0xa9   : > { %334 = vrot.lane.b32.xlu0 %v330_v22, %s784_s25 }
  0xae   : > { %v417_v25 = vpop.permute.xlu0 %416  ;;  %v975_v30 = vpop.permute.xlu2 %279 }
  0xaf   : > { %v420_v26 = vpop.permute.xlu1 %419  ;;  %v418_v27 = vsel %vm139_vm0, %v417_v25, %v914_v5 }
  0xb0   : > { %v421_v28 = vsel %vm139_vm0, %v420_v26, %v916_v6  ;;  %336 = vrot.lane.b32.xlu1 %v333_v24, %s784_s25  ;;  %422 = vrot.lane.b32.xlu2 %v418_v27, %s784_s25  ;;  %v274_v26 = vmul.f32 0.78698605, %v898_v2 }
  0xb1   : > { %424 = vrot.lane.b32.xlu0 %v421_v28, %s784_s25 }
  0xb6   : > { %v979_v32 = vpop.permute.xlu0 %254 }
  0xb7   : > { %v973_v29 = vpop.permute.xlu1 %259  ;;  %v981_v33 = vpop.permute.xlu2 %347 }
  0xb8   : > { %371 = vperm.xlu1 %681, %v929_v9   ;;  %455 = vperm.xlu2 %682, %v914_v5  }
  0xb9   : > { %187 = vperm.xlu0 %680, %v905_v3  }
  0xbe   : > { %v985_v35 = vpop.permute.xlu0 %435 }
  0xbf   : > { %v987_v36 = vpop.permute.xlu2 %430 }
  0xc0   : > { %v977_v31 = vpop.permute.xlu1 %283 }
  0xc1   : > { %367 = vperm.xlu0 %680, %v907_v4  }
  0xc9   : > { %v983_v34 = vpop.permute.xlu1 %342 }
  0xfa   : > { %v249_v40 = vpop.permute.xlu2 %248 }
  0xfb   : > { %v251_v42 = vsel %vm139_vm0, %v249_v40, %v923_v8 }
 0x10a   : > { %v423_v51 = vpop.permute.xlu2 %422 }
 0x10b   : > { %v426_v52 = vsel %vm139_vm0, %v423_v51, %v914_v5 }
 0x112   : > { %v147_v37 = vpop.permute.xlu1 %146  ;;  %v1006_v53 = vpop.permute.xlu2 %455 }
 0x113   : > { %v150_v38 = vsel %vm139_vm0, %v147_v37, %v896_v1  ;;  %v247_v39 = vpop.permute.xlu0 %246 }
 0x114   : > { %167 = vrot.lane.b32.xlu0 %v150_v38, %s786_s17  ;;  %v250_v46 = vsel %vm139_vm0, %v247_v39, %v898_v2 }
 0x11a   : > { %v149_v41 = vpop.permute.xlu1 %148 }
 0x11b   : > { %v151_v43 = vsel %vm139_vm0, %v149_v41, %v905_v3  ;;  %v335_v44 = vpop.permute.xlu0 %334  ;;  %v275_v41 = vmul.f32 0.78698605, %v923_v8 }
 0x11c   : > { %288 = vrot.lane.b32.xlu0 %v251_v42, %s787_s26  ;;  %169 = vrot.lane.b32.xlu1 %v151_v43, %s786_s17  ;;  %v338_v45 = vsel %vm139_vm0, %v335_v44, %v907_v4 }
 0x11d   : > { %192 = vrot.lane.b32.xlu2 %v151_v43, %s787_s26 }
 0x122   : > { %v337_v47 = vpop.permute.xlu1 %336 }
 0x123   : > { %v425_v48 = vpop.permute.xlu0 %424  ;;  %v339_v49 = vsel %vm139_vm0, %v337_v47, %v929_v9 }
 0x124   : > { %190 = vrot.lane.b32.xlu1 %v150_v38, %s787_s26  ;;  %352 = vrot.lane.b32.xlu0 %v338_v45, %s786_s17  ;;  %v427_v50 = vsel %vm139_vm0, %v425_v48, %v916_v6 }
 0x125   : > { %264 = vrot.lane.b32.xlu2 %v250_v46, %s786_s17 }
 0x12a   : > { %v1010_v57 = vpop.permute.xlu1 %371 }
 0x12b   : > { %v188_v54 = vpop.permute.xlu0 %187 }
 0x12c   : > { %266 = vrot.lane.b32.xlu1 %v251_v42, %s786_s17  ;;  %459 = vperm.xlu0 %680, %v916_v6  }
 0x12d   : > { %286 = vrot.lane.b32.xlu2 %v250_v46, %s787_s26 }
 0x133   : > { %v1008_v56 = vpop.permute.xlu0 %367 }
 0x134   : > { %354 = vrot.lane.b32.xlu1 %v339_v49, %s786_s17 }
 0x135   : > { %442 = vrot.lane.b32.xlu2 %v427_v50, %s786_s17 }
 0x13c   : > { %440 = vrot.lane.b32.xlu1 %v426_v52, %s786_s17 }
 0x13d   : > { %374 = vrot.lane.b32.xlu2 %v338_v45, %s787_s26 }
 0x144   : > { %376 = vrot.lane.b32.xlu1 %v339_v49, %s787_s26 }
 0x145   : > { %464 = vrot.lane.b32.xlu2 %v427_v50, %s787_s26 }
 0x14c   : > { %462 = vrot.lane.b32.xlu1 %v426_v52, %s787_s26 }
 0x177   : > { %v193_v55 = vpop.permute.xlu2 %192 }
 0x178   : > { %v197_v14 = vsel %vm181_vm2, %v188_v54, %v193_v55 }
 0x179   : > { %v199_v19 = vmul.f32 0.10650698, %v197_v14 }
 0x17f   : > { %v265_v60 = vpop.permute.xlu2 %264 }
 0x180   : > { %v270_v22 = vsel %vm154_vm1, %v979_v32, %v265_v60 }
 0x181   : > { %v272_v27 = vmul.f32 0.10650698, %v270_v22 }
 0x183   : > { %v276_v52 = vadd.f32 %v274_v26, %v272_v27 }
 0x186   : > { %v168_v61 = vpop.permute.xlu0 %167 }
 0x187   : > { %v173_v13 = vsel %vm154_vm1, %v939_v10, %v168_v61  ;;  %v287_v20 = vpop.permute.xlu2 %286 }
 0x188   : > { %v175_v17 = vmul.f32 0.10650698, %v173_v13  ;;  %v292_v1 = vsel %vm181_vm2, %v975_v30, %v287_v20 }
 0x189   : > { %v294_v39 = vmul.f32 0.10650698, %v292_v1 }
 0x18a   : > { %v179_v23 = vadd.f32 %v177_v18, %v175_v17 }
 0x18e   : > { %v170_v62 = vpop.permute.xlu1 %169  ;;  %v289_v43 = vpop.permute.xlu0 %288 }
 0x18f   : > { %v174_v0 = vsel %vm154_vm1, %v941_v11, %v170_v62  ;;  %v1029_v11 = vadd.s32 8, %v1025_v15  ;;  %v293_v54 = vsel %vm181_vm2, %v977_v31, %v289_v43  ;;  %v443_v60 = vpop.permute.xlu2 %442 }
 0x190   : > { %v176_v7 = vmul.f32 0.10650698, %v174_v0  ;;  %v296_v0 = vadd.f32 %v294_v39, %v276_v52  ;;  %v295_v13 = vmul.f32 0.10650698, %v293_v54 }
 0x191   : > { %vm226_vm5 = vcmp.ge.s32.totalorder %v1029_v11, 15 }
 0x192   : > { %v180_v16 = vadd.f32 %v178_v63, %v176_v7  ;;  %v298_v17 = vrot.slane %v296_v0, 7  ;;  %v311_v18 = vrot.slane %v296_v0, 1 }
 0x194   : > { %v201_v21 = vadd.f32 %v199_v19, %v180_v16 }
 0x196   : > { %v191_v3 = vpop.permute.xlu1 %190  ;;  %v203_v28 = vrot.slane %v201_v21, 7  ;;  %v227_v40 = vperm.slane %v201_v21, 7  ;;  %v217_v42 = vmul.f32 0.78698605, %v201_v21 }
 0x197   : > { %v196_v10 = vsel %vm181_vm2, %v943_v12, %v191_v3  ;;  %v221_v12 = vrot.slane %v201_v21, 1  ;;  %v302_v21 = vperm.slane %v296_v0, 0 }
 0x198   : > { %v198_v24 = vmul.f32 0.10650698, %v196_v10  ;;  %v353_v10 = vpop.permute.xlu0 %352 }
 0x19a   : > { %v200_v25 = vadd.f32 %v198_v24, %v179_v23 }
 0x19c   : > { %v202_v37 = vrot.slane %v200_v25, 7  ;;  %v211_v32 = vperm.slane %v200_v25, 0  ;;  %v220_v38 = vrot.slane %v200_v25, 1  ;;  %v216_v50 = vmul.f32 0.78698605, %v200_v25 }
 0x19e   : > { %v207_v30 = vsel %vm206_vm3, %v202_v37, %v203_v28  ;;  %v208_v2 = vsel %vm206_vm3, %v203_v28, %v202_v37  ;;  %v224_v44 = vsel %vm222_vm4, %v221_v12, %v220_v38  ;;  %v267_v45 = vpop.permute.xlu1 %266  ;;  %v223_v48 = vsel %vm222_vm4, %v220_v38, %v221_v12  ;;  %v375_v37 = vpop.permute.xlu2 %374 }
 0x19f   : > { %v212_v46 = vsel %vm206_vm3, %v211_v32, %v208_v2  ;;  %v215_v47 = vmul.f32 0.10650698, %v207_v30  ;;  %v229_v8 = vsel %vm226_vm5, %v227_v40, %v224_v44  ;;  %v271_v58 = vsel %vm154_vm1, %v973_v29, %v267_v45 }
 0x1a0   : > { %v214_v49 = vmul.f32 0.10650698, %v212_v46  ;;  %v231_v51 = vmul.f32 0.10650698, %v229_v8  ;;  %v230_v62 = vmul.f32 0.10650698, %v223_v48  ;;  %v358_v32 = vsel %vm154_vm1, %v983_v34, %v353_v10 }
 0x1a1   : > { %v219_v55 = vadd.f32 %v217_v42, %v215_v47  ;;  %v273_v63 = vmul.f32 0.10650698, %v271_v58  ;;  %v307_v12 = vmul.f32 0.78698605, %v296_v0  ;;  %v362_v30 = vmul.f32 0.78698605, %v907_v4 }
 0x1a2   : > { %v218_v61 = vadd.f32 %v216_v50, %v214_v49  ;;  %v360_v2 = vmul.f32 0.10650698, %v358_v32  ;;  %v380_v34 = vsel %vm181_vm2, %v1008_v56, %v375_v37  ;;  %v363_v48 = vmul.f32 0.78698605, %v929_v9  ;;  %v460_v49 = vpop.permute.xlu0 %459 }
 0x1a3   : > { %v233_v7 = vadd.f32 %v231_v51, %v219_v55  ;;  %v277_v16 = vadd.f32 %v275_v41, %v273_v63  ;;  %v382_v4 = vmul.f32 0.10650698, %v380_v34  ;;  %v447_v50 = vsel %vm154_vm1, %v985_v35, %v443_v60 }
 0x1a4   : > { %v232_v14 = vadd.f32 %v230_v62, %v218_v61  ;;  %v364_v47 = vadd.f32 %v362_v30, %v360_v2  ;;  %v451_v58 = vmul.f32 0.78698605, %v916_v6  ;;  %v449_v61 = vmul.f32 0.10650698, %v447_v50 }
 0x1a5   : > { %236 = vst.msk [vmem:[%s1065_s27 + $0x8] sm:$0xff] %vm234_vm6, %v233_v7  ;;  %v297_v29 = vadd.f32 %v295_v13, %v277_v16  ;;  %v450_v0 = vmul.f32 0.78698605, %v914_v5 }
 0x1a6   : > { %235 = vst.msk [vmem:[%s1065_s27] sm:$0xff] %vm234_vm6, %v232_v14  ;;  %v355_v31 = vpop.permute.xlu1 %354  ;;  %v465_v51 = vpop.permute.xlu2 %464  ;;  %v384_v54 = vadd.f32 %v382_v4, %v364_v47  ;;  %v453_v16 = vadd.f32 %v451_v58, %v449_v61 }
 0x1a7   : > { %v299_v19 = vrot.slane %v297_v29, 7  ;;  %v312_v3 = vrot.slane %v297_v29, 1  ;;  %v315_v20 = vperm.slane %v297_v29, 7  ;;  %v308_v24 = vmul.f32 0.78698605, %v297_v29 }
 0x1a8   : > { %v359_v46 = vsel %vm154_vm1, %v981_v33, %v355_v31  ;;  %v469_v9 = vsel %vm181_vm2, %v460_v49, %v465_v51  ;;  %v386_v60 = vrot.slane %v384_v54, 7  ;;  %v399_v63 = vrot.slane %v384_v54, 1 }
 0x1a9   : > { %v300_v22 = vsel %vm206_vm3, %v298_v17, %v299_v19  ;;  %v301_v23 = vsel %vm206_vm3, %v299_v19, %v298_v17  ;;  %v314_v1 = vsel %vm222_vm4, %v312_v3, %v311_v18  ;;  %v313_v27 = vsel %vm222_vm4, %v311_v18, %v312_v3 }
 0x1aa   : > { %v303_v25 = vsel %vm206_vm3, %v302_v21, %v301_v23  ;;  %v306_v26 = vmul.f32 0.10650698, %v300_v22  ;;  %v317_v28 = vsel %vm226_vm5, %v315_v20, %v314_v1  ;;  %v318_v42 = vmul.f32 0.10650698, %v313_v27 }
 0x1ab   : > { %v305_v38 = vmul.f32 0.10650698, %v303_v25  ;;  %v319_v39 = vmul.f32 0.10650698, %v317_v28  ;;  %v361_v8 = vmul.f32 0.10650698, %v359_v46 }
 0x1ac   : > { %v310_v40 = vadd.f32 %v308_v24, %v306_v26  ;;  %v471_v7 = vmul.f32 0.10650698, %v469_v9  ;;  %v390_v29 = vperm.slane %v384_v54, 0  ;;  %v395_v6 = vmul.f32 0.78698605, %v384_v54 }
 0x1ad   : > { %v309_v41 = vadd.f32 %v307_v12, %v305_v38  ;;  %v365_v56 = vadd.f32 %v363_v48, %v361_v8 }
 0x1ae   : > { %v441_v43 = vpop.permute.xlu1 %440  ;;  %v321_v44 = vadd.f32 %v319_v39, %v310_v40  ;;  %v473_v22 = vadd.f32 %v471_v7, %v453_v16 }
 0x1af   : > { %v320_v45 = vadd.f32 %v318_v42, %v309_v41  ;;  %v446_v62 = vsel %vm154_vm1, %v987_v36, %v441_v43 }
 0x1b0   : > { %602 = vst.msk [vmem:[%s1065_s27 + $0x18] sm:$0xff] %vm234_vm6, %v321_v44  ;;  %v448_v31 = vmul.f32 0.10650698, %v446_v62  ;;  %v475_v38 = vrot.slane %v473_v22, 7  ;;  %v488_v40 = vrot.slane %v473_v22, 1 }
 0x1b1   : > { %601 = vst.msk [vmem:[%s1065_s27 + $0x10] sm:$0xff] %vm234_vm6, %v320_v45  ;;  %v484_v59 = vmul.f32 0.78698605, %v473_v22 }
 0x1b2   : > { %v452_v25 = vadd.f32 %v450_v0, %v448_v31 }
 0x1b6   : > { %v377_v52 = vpop.permute.xlu1 %376 }
 0x1b7   : > { %v381_v33 = vsel %vm181_vm2, %v1010_v57, %v377_v52 }
 0x1b8   : > { %v383_v55 = vmul.f32 0.10650698, %v381_v33 }
 0x1ba   : > { %v385_v35 = vadd.f32 %v383_v55, %v365_v56 }
 0x1bc   : > { %v387_v13 = vrot.slane %v385_v35, 7  ;;  %v400_v57 = vrot.slane %v385_v35, 1  ;;  %v403_v14 = vperm.slane %v385_v35, 7  ;;  %v396_v36 = vmul.f32 0.78698605, %v385_v35 }
 0x1be   : > { %v388_v17 = vsel %vm206_vm3, %v386_v60, %v387_v13  ;;  %v389_v18 = vsel %vm206_vm3, %v387_v13, %v386_v60  ;;  %v402_v19 = vsel %vm222_vm4, %v400_v57, %v399_v63  ;;  %v463_v5 = vpop.permute.xlu1 %462  ;;  %v401_v21 = vsel %vm222_vm4, %v399_v63, %v400_v57 }
 0x1bf   : > { %v391_v3 = vsel %vm206_vm3, %v390_v29, %v389_v18  ;;  %v394_v20 = vmul.f32 0.10650698, %v388_v17  ;;  %v405_v10 = vsel %vm226_vm5, %v403_v14, %v402_v19  ;;  %v468_v1 = vsel %vm181_vm2, %v1006_v53, %v463_v5 }
 0x1c0   : > { %v393_v23 = vmul.f32 0.10650698, %v391_v3  ;;  %v407_v24 = vmul.f32 0.10650698, %v405_v10  ;;  %v470_v27 = vmul.f32 0.10650698, %v468_v1 }
 0x1c1   : > { %v398_v26 = vadd.f32 %v396_v36, %v394_v20  ;;  %v406_v12 = vmul.f32 0.10650698, %v401_v21  ;;  %v491_v53 = vperm.slane %v473_v22, 7 }
 0x1c2   : > { %v397_v28 = vadd.f32 %v395_v6, %v393_v23  ;;  %v472_v32 = vadd.f32 %v470_v27, %v452_v25 }
 0x1c3   : > { %v409_v37 = vadd.f32 %v407_v24, %v398_v26 }
 0x1c4   : > { %v408_v39 = vadd.f32 %v406_v12, %v397_v28  ;;  %v474_v41 = vrot.slane %v472_v32, 7  ;;  %v478_v42 = vperm.slane %v472_v32, 0  ;;  %v487_v43 = vrot.slane %v472_v32, 1 }
 0x1c5   : > { %606 = vst.msk [vmem:[%s1065_s27 + $0x28] sm:$0xff] %vm234_vm6, %v409_v37  ;;  %v483_v8 = vmul.f32 0.78698605, %v472_v32 }
 0x1c6   : > { %605 = vst.msk [vmem:[%s1065_s27 + $0x20] sm:$0xff] %vm234_vm6, %v408_v39  ;;  %v476_v30 = vsel %vm206_vm3, %v474_v41, %v475_v38  ;;  %v477_v2 = vsel %vm206_vm3, %v475_v38, %v474_v41  ;;  %v490_v44 = vsel %vm222_vm4, %v488_v40, %v487_v43  ;;  %v489_v34 = vsel %vm222_vm4, %v487_v43, %v488_v40 }
 0x1c7   : > { %v479_v45 = vsel %vm206_vm3, %v478_v42, %v477_v2  ;;  %v482_v46 = vmul.f32 0.10650698, %v476_v30  ;;  %v493_v47 = vsel %vm226_vm5, %v491_v53, %v490_v44  ;;  %v494_v51 = vmul.f32 0.10650698, %v489_v34 }
 0x1c8   : > { %v481_v48 = vmul.f32 0.10650698, %v479_v45  ;;  %v495_v4 = vmul.f32 0.10650698, %v493_v47 }
 0x1c9   : > { %v486_v49 = vadd.f32 %v484_v59, %v482_v46 }
 0x1ca   : > { %v485_v50 = vadd.f32 %v483_v8, %v481_v48 }
 0x1cb   : > { %v497_v52 = vadd.f32 %v495_v4, %v486_v49 }
 0x1cc   : > { %v496_v54 = vadd.f32 %v494_v51, %v485_v50 }
 0x1cd   : > { %610 = vst.msk [vmem:[%s1065_s27 + $0x38] sm:$0xff] %vm234_vm6, %v497_v52 }
 0x1ce   : > { %609 = vst.msk [vmem:[%s1065_s27 + $0x30] sm:$0xff] %vm234_vm6, %v496_v54 }
 0x1cf   : > { %740 = shalt.err (!%p737_p4)
}
 0x1d0   : > { %s788_s21 = smov 128   ;;  %s789_s23 = smov 8  }
 0x1d1   : > { %620 = dma.vmem_to_hbm [thread:$0]  (%p850_p11), %s515_s10, 1024, %s517_s3, %s502_s4, %s788_s21, %s788_s21, %s789_s23  }
 0x1d2 PF: > { %s531_s24 = sand.u32 1, %s767_s6   ;;  %p1187_p7 = scmp.ge.s32.totalorder %s779_s9, 2 }
 0x1d3   : > { %s532_s25 = scalar_lea.sflag [#allocation4], %s531_s24 }
 0x1d4   : > { %p627_p5 = pnand %p1187_p7, %p854_p12 }
 0x1d6   : > { %p628_p8 = pneg %p627_p5 }
 0x1d8   : > { %762 = dma.done.wait (%p628_p8), %s532_s25, 1024  }
 0x1d9   : > { %764 = vsyncadd (%p628_p8), %s532_s25, 4294966272  ;;  %p14_p10 = scmp.ge.s32.totalorder %s825_s12, 4   ;;  %s1188_s6 = smov %s771_s7 }
 0x1da   : > { %s1189_s7 = smov %s775_s8  ;;  %s1190_s8 = smov %s837_s15 }
 0x1db   : > { %s1191_s9 = smov %s825_s12  ;;  %16 = sbr.rel (!%p14_p10) target bundleno = 5 (0x5), region = 75 }
 0x1e0   :  { %538 = vsyncpa [#allocation3], 1 }
 0x1e1   :  { %540 = vsyncpa [#allocation3 + $0x1], 1 }
 0x1e2   :  { %541 = vsyncpa [#allocation4], 1 }
 0x1e3   :  { %543 = vsyncpa [#allocation4 + $0x1], 1 }

</bundles_post_ra>
